<compile_context>
chip_gen: v7x
topology: tpu7x:2x2x1
jax: 0.10.0
libtpu: 0.0.40
codegen_flags: <defaults>
</compile_context>

<pallas_src>
import jax
import jax.numpy as jnp
import numpy as np
from jax.experimental import pallas as pl
from jax.experimental.pallas import tpu as pltpu  # noqa: F401  (TPU backend assumed)


# ----------------------------- model hyperparams -----------------------------
B = 2          # batch
S = 8          # sequence length
D = 32         # d_model
H = 4          # n_head
HD = D // H    # head dim
N = B * S      # flattened tokens
EPS = 1e-5


def _layernorm(x, gamma, beta):
    # fp32 layernorm (matches the LayerNorm subclass which upcasts to fp32)
    xf = x.astype(jnp.float32)
    mean = jnp.mean(xf, axis=-1, keepdims=True)
    var = jnp.mean((xf - mean) ** 2, axis=-1, keepdims=True)
    inv = jax.lax.rsqrt(var + EPS)
    return (xf - mean) * inv * gamma + beta


def _block_kernel(x_ref, w_ref, wpr_ref, vec_ref, mask_ref, o_ref):
    x = x_ref[...]                      # (N, D)      f32
    w = w_ref[...]                      # (D, 8D)     f32: [w_qkv | w_o | w_fc]
    vec = vec_ref[...]                  # (8, 4D)     f32: bias/gain rows, padded
    masks = mask_ref[...]               # (H*N, D+N)  f32: [head_mask | batch_bias]

    w_qkv = w[:, 0:3 * D]               # (D, 3D)  Q columns pre-scaled by 1/sqrt(HD)
    w_o = w[:, 3 * D:4 * D]             # (D, D)
    w_fc = w[:, 4 * D:8 * D]            # (D, 4D)

    ln1_g = vec[0:1, 0:D]
    ln1_b = vec[1:2, 0:D]
    b_o = vec[2:3, 0:D]
    ln2_g = vec[3:4, 0:D]
    ln2_b = vec[4:5, 0:D]
    b_pr = vec[5:6, 0:D]
    b_fc = vec[6:7, 0:4 * D]
    b_qkv = vec[7:8, 0:3 * D]           # Q part pre-scaled by 1/sqrt(HD)

    head_mask = masks[:, 0:D]           # (H*N, D) 0/1: head h's lanes live in rows [h*N:(h+1)*N]
    batch_bias = masks[:, D:D + N]      # (H*N, N) 0 / -1e30 block-diagonal batch mask

    # --------------------- x = x + attn(ln_1(x)) ---------------------
    h = _layernorm(x, ln1_g, ln1_b)

    # Fused QKV projection: one (N, D) @ (D, 3D) matmul; scale already folded in.
    # TODO(synk): at real CLIP sizes, cast matmul inputs to bf16 (v6e/v7x) and
    # reintroduce a token grid with lane-dense (multiple-of-128) blocks; kept f32 and
    # single-shot here because (16, 32) is entirely launch/DMA-latency bound.
    qkv = jnp.dot(h, w_qkv, preferred_element_type=jnp.float32) + b_qkv
    q = qkv[:, 0 * D:1 * D]             # (N, D), already scaled via folded weights
    k = qkv[:, 1 * D:2 * D]             # (N, D)
    v = qkv[:, 2 * D:3 * D]             # (N, D)

    # Stack the H heads along the sublane axis: row (hh*N + n) holds q[n, :] with
    # every lane outside head hh zeroed, so all-head scores fall out of ONE
    # full-width contraction.
    q_stack = jnp.concatenate([q] * H, axis=0) * head_mask            # (H*N, D)
    s = jax.lax.dot_general(q_stack, k, (((1,), (1,)), ((), ())),
                            preferred_element_type=jnp.float32)       # (H*N, N)

    # Additive -1e30 bias keeps cross-batch keys out (safe in f32; revisit the
    # max-subtraction if this ever becomes a multiplicative 0/1 mask after exp).
    s = s + batch_bias
    s = s - jnp.max(s, axis=-1, keepdims=True)
    p = jnp.exp(s)
    p = p / jnp.sum(p, axis=-1, keepdims=True)                        # exact divide

    # Weighted values for every head at once: (H*N, N) @ (N, D).
    o_stack = jnp.dot(p, v, preferred_element_type=jnp.float32)       # (H*N, D)

    # Keep head hh's lanes from head hh's row block, then sum the H row blocks
    # (sublane-aligned static slices; no lane-offset slicing, no concatenate).
    o_masked = o_stack * head_mask
    attn = o_masked[0:N]
    for hh in range(1, H):
        attn = attn + o_masked[hh * N:(hh + 1) * N]                   # (N, D)

    attn = jnp.dot(attn, w_o, preferred_element_type=jnp.float32) + b_o
    x = x + attn

    # --------------------- x = x + mlp(ln_2(x)) ---------------------
    h2 = _layernorm(x, ln2_g, ln2_b)
    m = jnp.dot(h2, w_fc, preferred_element_type=jnp.float32) + b_fc
    m = m * jax.nn.sigmoid(1.702 * m)   # QuickGELU
    # TODO(synk): nn.Dropout layers are identity in eval mode; intentionally omitted.
    m = jnp.dot(m, wpr_ref[...], preferred_element_type=jnp.float32) + b_pr

    o_ref[...] = x + m


def prepare_params(params):
    """One-time host-side packing (hoisted out of the per-call path)."""
    scale = 1.0 / (HD ** 0.5)
    # Fuse Q/K/V into one (D, 3D) weight and fold the attention scale into Q.
    w_qkv = jnp.concatenate(
        [params["wq"].T * scale, params["wk"].T, params["wv"].T], axis=1)       # (D, 3D)
    b_qkv = jnp.concatenate(
        [params["bq"] * scale, params["bk"], params["bv"]], axis=1)             # (1, 3D)

    # One weight slab for the three (D, ·) matmuls; c_proj stays separate (4D rows).
    w_slab = jnp.concatenate([w_qkv, params["wo"].T, params["wfc"].T], axis=1)  # (D, 8D)
    wpr_t = params["wpr"].T                                                     # (4D, D)

    def pad_row(v):
        return jnp.pad(v, ((0, 0), (0, 4 * D - v.shape[1])))

    # All eight tiny bias/gain vectors in one (8, 4D) slab = exactly one vreg.
    vec_slab = jnp.concatenate([
        pad_row(params["ln1_g"]), pad_row(params["ln1_b"]), pad_row(params["bo"]),
        pad_row(params["ln2_g"]), pad_row(params["ln2_b"]), pad_row(params["bpr"]),
        pad_row(params["bfc"]), pad_row(b_qkv)], axis=0)                        # (8, 4D)

    # Compile-time constant masks, built once on the host instead of iota'd in-kernel.
    rows = np.arange(H * N)
    head_mask = (rows[:, None] // N == np.arange(D)[None, :] // HD).astype(np.float32)
    batch_bias = np.where(
        (rows[:, None] % N) // S == np.arange(N)[None, :] // S, 0.0, -1e30
    ).astype(np.float32)
    mask_slab = jnp.asarray(np.concatenate([head_mask, batch_bias], axis=1))    # (H*N, D+N)

    return {"w_slab": w_slab, "wpr_t": wpr_t,
            "vec_slab": vec_slab, "mask_slab": mask_slab}


@jax.jit
def residual_attention_block(x, packed):
    """x: (B, S, D) float32; packed: output of prepare_params."""
    x2d = x.reshape(N, D).astype(jnp.float32)
    # Single invocation, no grid: every operand resident in VMEM once
    # (total footprint < 100 KB), so no per-step pipeline overhead.
    out = pl.pallas_call(
        _block_kernel,
        out_shape=jax.ShapeDtypeStruct((N, D), jnp.float32),
    )(x2d, packed["w_slab"], packed["wpr_t"], packed["vec_slab"], packed["mask_slab"])
    return out.reshape(B, S, D)


# ------------------------------ pure-JAX reference ------------------------------
def reference(x, p):
    def ln(x, g, b):
        m = jnp.mean(x, -1, keepdims=True)
        v = jnp.mean((x - m) ** 2, -1, keepdims=True)
        return (x - m) / jnp.sqrt(v + EPS) * g + b

    h = ln(x, p["ln1_g"], p["ln1_b"])
    q = h @ p["wq"].T + p["bq"]
    k = h @ p["wk"].T + p["bk"]
    v = h @ p["wv"].T + p["bv"]
    q = q.reshape(B, S, H, HD).transpose(0, 2, 1, 3) / (HD ** 0.5)
    k = k.reshape(B, S, H, HD).transpose(0, 2, 1, 3)
    v = v.reshape(B, S, H, HD).transpose(0, 2, 1, 3)
    s = jnp.einsum("bhqd,bhkd->bhqk", q, k)
    a = jax.nn.softmax(s, axis=-1)
    o = jnp.einsum("bhqk,bhkd->bhqd", a, v).transpose(0, 2, 1, 3).reshape(B, S, D)
    o = o @ p["wo"].T + p["bo"]
    x = x + o
    h2 = ln(x, p["ln2_g"], p["ln2_b"])
    m = h2 @ p["wfc"].T + p["bfc"]
    m = m * jax.nn.sigmoid(1.702 * m)
    m = m @ p["wpr"].T + p["bpr"]
    return x + m


# ----------------------------------- driver -----------------------------------
if __name__ == "__main__":
    key = jax.random.PRNGKey(0)
    keys = jax.random.split(key, 16)

    def rnd(k, shape, scale=0.05):
        return (scale * jax.random.normal(k, shape)).astype(jnp.float32)

    # Parameter shapes follow nn.MultiheadAttention / nn.Linear / nn.LayerNorm.
    in_proj_w = rnd(keys[0], (3 * D, D))     # in_proj_weight
    in_proj_b = rnd(keys[1], (3 * D,))       # in_proj_bias
    params = {
        "ln1_g": jnp.ones((1, D), jnp.float32),
        "ln1_b": jnp.zeros((1, D), jnp.float32),
        "wq": in_proj_w[0 * D:1 * D], "wk": in_proj_w[1 * D:2 * D], "wv": in_proj_w[2 * D:3 * D],
        "bq": in_proj_b[0 * D:1 * D].reshape(1, D),
        "bk": in_proj_b[1 * D:2 * D].reshape(1, D),
        "bv": in_proj_b[2 * D:3 * D].reshape(1, D),
        "wo": rnd(keys[2], (D, D)),
        "bo": rnd(keys[3], (D,)).reshape(1, D),
        "ln2_g": jnp.ones((1, D), jnp.float32),
        "ln2_b": jnp.zeros((1, D), jnp.float32),
        "wfc": rnd(keys[4], (4 * D, D)),
        "bfc": rnd(keys[5], (4 * D,)).reshape(1, 4 * D),
        "wpr": rnd(keys[6], (D, 4 * D)),
        "bpr": rnd(keys[7], (D,)).reshape(1, D),
    }

    x = jax.random.normal(keys[8], (B, S, D), dtype=jnp.float32)

    packed = jax.tree_util.tree_map(jax.block_until_ready, prepare_params(params))
    out = residual_attention_block(x, packed)
    out = jax.block_until_ready(out)

    ref = reference(x, params)
    assert out.shape == (B, S, D)
    assert jnp.allclose(out, ref, atol=1e-4, rtol=1e-4), float(jnp.max(jnp.abs(out - ref)))

    print("KERNEL_OK")
</pallas_src>

<mosaic_0001>
module attributes {stable_mosaic.version = 11 : i64} {
  func.func @_block_kernel(%arg0: memref<16x32xf32, #tpu.memory_space<vmem>>, %arg1: memref<32x256xf32, #tpu.memory_space<vmem>>, %arg2: memref<128x32xf32, #tpu.memory_space<vmem>>, %arg3: memref<8x128xf32, #tpu.memory_space<vmem>>, %arg4: memref<64x48xf32, #tpu.memory_space<vmem>>, %arg5: memref<16x32xf32, #tpu.memory_space<vmem>>) attributes {dimension_semantics = [], scalar_prefetch = 0 : i64, scratch_operands = 0 : i64, tpu.core_type = #tpu.core_type<tc>} {
    %c0 = arith.constant 0 : index
    %c0_0 = arith.constant 0 : index
    %0 = vector.load %arg0[%c0, %c0_0] : memref<16x32xf32, #tpu.memory_space<vmem>>, vector<16x32xf32>
    %c0_1 = arith.constant 0 : index
    %c0_2 = arith.constant 0 : index
    %1 = vector.load %arg1[%c0_1, %c0_2] : memref<32x256xf32, #tpu.memory_space<vmem>>, vector<32x256xf32>
    %c0_3 = arith.constant 0 : index
    %c0_4 = arith.constant 0 : index
    %2 = vector.load %arg3[%c0_3, %c0_4] : memref<8x128xf32, #tpu.memory_space<vmem>>, vector<8x128xf32>
    %c0_5 = arith.constant 0 : index
    %c0_6 = arith.constant 0 : index
    %3 = vector.load %arg4[%c0_5, %c0_6] : memref<64x48xf32, #tpu.memory_space<vmem>>, vector<64x48xf32>
    %4 = vector.extract_strided_slice %1 {offsets = [0, 0], sizes = [32, 96], strides = [1, 1]} : vector<32x256xf32> to vector<32x96xf32>
    %5 = vector.extract_strided_slice %1 {offsets = [0, 96], sizes = [32, 32], strides = [1, 1]} : vector<32x256xf32> to vector<32x32xf32>
    %6 = vector.extract_strided_slice %1 {offsets = [0, 128], sizes = [32, 128], strides = [1, 1]} : vector<32x256xf32> to vector<32x128xf32>
    %7 = vector.extract_strided_slice %2 {offsets = [0, 0], sizes = [1, 32], strides = [1, 1]} : vector<8x128xf32> to vector<1x32xf32>
    %8 = vector.extract_strided_slice %2 {offsets = [1, 0], sizes = [1, 32], strides = [1, 1]} : vector<8x128xf32> to vector<1x32xf32>
    %9 = vector.extract_strided_slice %2 {offsets = [2, 0], sizes = [1, 32], strides = [1, 1]} : vector<8x128xf32> to vector<1x32xf32>
    %10 = vector.extract_strided_slice %2 {offsets = [3, 0], sizes = [1, 32], strides = [1, 1]} : vector<8x128xf32> to vector<1x32xf32>
    %11 = vector.extract_strided_slice %2 {offsets = [4, 0], sizes = [1, 32], strides = [1, 1]} : vector<8x128xf32> to vector<1x32xf32>
    %12 = vector.extract_strided_slice %2 {offsets = [5, 0], sizes = [1, 32], strides = [1, 1]} : vector<8x128xf32> to vector<1x32xf32>
    %13 = vector.extract_strided_slice %2 {offsets = [6, 0], sizes = [1, 128], strides = [1, 1]} : vector<8x128xf32> to vector<1x128xf32>
    %14 = vector.extract_strided_slice %2 {offsets = [7, 0], sizes = [1, 96], strides = [1, 1]} : vector<8x128xf32> to vector<1x96xf32>
    %15 = vector.extract_strided_slice %3 {offsets = [0, 0], sizes = [64, 32], strides = [1, 1]} : vector<64x48xf32> to vector<64x32xf32>
    %16 = vector.extract_strided_slice %3 {offsets = [0, 32], sizes = [64, 16], strides = [1, 1]} : vector<64x48xf32> to vector<64x16xf32>
    %cst = arith.constant dense<0.000000e+00> : vector<16xf32>
    %17 = vector.multi_reduction <add>, %0, %cst [1] : vector<16x32xf32> to vector<16xf32>
    %18 = vector.shape_cast %17 : vector<16xf32> to vector<16x1xf32>
    %cst_7 = arith.constant 3.200000e+01 : f32
    %19 = vector.broadcast %cst_7 : f32 to vector<16x1xf32>
    %20 = arith.divf %18, %19 : vector<16x1xf32>
    %21 = vector.broadcast %20 : vector<16x1xf32> to vector<16x32xf32>
    %22 = arith.subf %0, %21 : vector<16x32xf32>
    %23 = arith.mulf %22, %22 : vector<16x32xf32>
    %cst_8 = arith.constant dense<0.000000e+00> : vector<16xf32>
    %24 = vector.multi_reduction <add>, %23, %cst_8 [1] : vector<16x32xf32> to vector<16xf32>
    %25 = vector.shape_cast %24 : vector<16xf32> to vector<16x1xf32>
    %cst_9 = arith.constant 3.200000e+01 : f32
    %26 = vector.broadcast %cst_9 : f32 to vector<16x1xf32>
    %27 = arith.divf %25, %26 : vector<16x1xf32>
    %cst_10 = arith.constant 9.99999974E-6 : f32
    %28 = vector.broadcast %cst_10 : f32 to vector<16x1xf32>
    %29 = arith.addf %27, %28 : vector<16x1xf32>
    %30 = math.rsqrt %29 : vector<16x1xf32>
    %31 = vector.broadcast %20 : vector<16x1xf32> to vector<16x32xf32>
    %32 = arith.subf %0, %31 : vector<16x32xf32>
    %33 = vector.broadcast %30 : vector<16x1xf32> to vector<16x32xf32>
    %34 = arith.mulf %32, %33 : vector<16x32xf32>
    %35 = vector.broadcast %7 : vector<1x32xf32> to vector<16x32xf32>
    %36 = arith.mulf %34, %35 : vector<16x32xf32>
    %37 = vector.broadcast %8 : vector<1x32xf32> to vector<16x32xf32>
    %38 = arith.addf %36, %37 : vector<16x32xf32>
    %cst_11 = arith.constant dense<0.000000e+00> : vector<16x96xf32>
    %39 = tpu.matmul %38, %4, %cst_11 {dimension_numbers = #tpu.dot_dimension_numbers<[1], [0], [0], [1], [0, 0, 1, 1], [], []>} : vector<16x32xf32>, vector<32x96xf32>, vector<16x96xf32> -> vector<16x96xf32>
    %40 = vector.broadcast %14 : vector<1x96xf32> to vector<16x96xf32>
    %41 = arith.addf %39, %40 : vector<16x96xf32>
    %42 = vector.extract_strided_slice %41 {offsets = [0, 0], sizes = [16, 32], strides = [1, 1]} : vector<16x96xf32> to vector<16x32xf32>
    %43 = vector.extract_strided_slice %41 {offsets = [0, 32], sizes = [16, 32], strides = [1, 1]} : vector<16x96xf32> to vector<16x32xf32>
    %44 = vector.extract_strided_slice %41 {offsets = [0, 64], sizes = [16, 32], strides = [1, 1]} : vector<16x96xf32> to vector<16x32xf32>
    %45 = tpu.concatenate %42, %42, %42, %42 in 0 : vector<16x32xf32>, vector<16x32xf32>, vector<16x32xf32>, vector<16x32xf32> -> vector<64x32xf32>
    %46 = arith.mulf %45, %15 : vector<64x32xf32>
    %cst_12 = arith.constant dense<0.000000e+00> : vector<64x16xf32>
    %47 = tpu.matmul %46, %43, %cst_12 {dimension_numbers = #tpu.dot_dimension_numbers<[1], [1], [0], [0], [0, 0, 1, 0], [], []>} : vector<64x32xf32>, vector<16x32xf32>, vector<64x16xf32> -> vector<64x16xf32>
    %48 = arith.addf %47, %16 : vector<64x16xf32>
    %cst_13 = arith.constant dense<0xFF800000> : vector<64xf32>
    %49 = vector.multi_reduction <maximumf>, %48, %cst_13 [1] : vector<64x16xf32> to vector<64xf32>
    %50 = vector.shape_cast %49 : vector<64xf32> to vector<64x1xf32>
    %51 = vector.broadcast %50 : vector<64x1xf32> to vector<64x16xf32>
    %52 = arith.subf %48, %51 : vector<64x16xf32>
    %53 = math.exp %52 : vector<64x16xf32>
    %cst_14 = arith.constant dense<0.000000e+00> : vector<64xf32>
    %54 = vector.multi_reduction <add>, %53, %cst_14 [1] : vector<64x16xf32> to vector<64xf32>
    %55 = vector.shape_cast %54 : vector<64xf32> to vector<64x1xf32>
    %56 = vector.broadcast %55 : vector<64x1xf32> to vector<64x16xf32>
    %57 = arith.divf %53, %56 : vector<64x16xf32>
    %cst_15 = arith.constant dense<0.000000e+00> : vector<64x32xf32>
    %58 = tpu.matmul %57, %44, %cst_15 {dimension_numbers = #tpu.dot_dimension_numbers<[1], [0], [0], [1], [0, 0, 1, 1], [], []>} : vector<64x16xf32>, vector<16x32xf32>, vector<64x32xf32> -> vector<64x32xf32>
    %59 = arith.mulf %58, %15 : vector<64x32xf32>
    %60 = vector.extract_strided_slice %59 {offsets = [0, 0], sizes = [16, 32], strides = [1, 1]} : vector<64x32xf32> to vector<16x32xf32>
    %61 = vector.extract_strided_slice %59 {offsets = [16, 0], sizes = [16, 32], strides = [1, 1]} : vector<64x32xf32> to vector<16x32xf32>
    %62 = arith.addf %60, %61 : vector<16x32xf32>
    %63 = vector.extract_strided_slice %59 {offsets = [32, 0], sizes = [16, 32], strides = [1, 1]} : vector<64x32xf32> to vector<16x32xf32>
    %64 = arith.addf %62, %63 : vector<16x32xf32>
    %65 = vector.extract_strided_slice %59 {offsets = [48, 0], sizes = [16, 32], strides = [1, 1]} : vector<64x32xf32> to vector<16x32xf32>
    %66 = arith.addf %64, %65 : vector<16x32xf32>
    %cst_16 = arith.constant dense<0.000000e+00> : vector<16x32xf32>
    %67 = tpu.matmul %66, %5, %cst_16 {dimension_numbers = #tpu.dot_dimension_numbers<[1], [0], [0], [1], [0, 0, 1, 1], [], []>} : vector<16x32xf32>, vector<32x32xf32>, vector<16x32xf32> -> vector<16x32xf32>
    %68 = vector.broadcast %9 : vector<1x32xf32> to vector<16x32xf32>
    %69 = arith.addf %67, %68 : vector<16x32xf32>
    %70 = arith.addf %0, %69 : vector<16x32xf32>
    %cst_17 = arith.constant dense<0.000000e+00> : vector<16xf32>
    %71 = vector.multi_reduction <add>, %70, %cst_17 [1] : vector<16x32xf32> to vector<16xf32>
    %72 = vector.shape_cast %71 : vector<16xf32> to vector<16x1xf32>
    %cst_18 = arith.constant 3.200000e+01 : f32
    %73 = vector.broadcast %cst_18 : f32 to vector<16x1xf32>
    %74 = arith.divf %72, %73 : vector<16x1xf32>
    %75 = vector.broadcast %74 : vector<16x1xf32> to vector<16x32xf32>
    %76 = arith.subf %70, %75 : vector<16x32xf32>
    %77 = arith.mulf %76, %76 : vector<16x32xf32>
    %cst_19 = arith.constant dense<0.000000e+00> : vector<16xf32>
    %78 = vector.multi_reduction <add>, %77, %cst_19 [1] : vector<16x32xf32> to vector<16xf32>
    %79 = vector.shape_cast %78 : vector<16xf32> to vector<16x1xf32>
    %cst_20 = arith.constant 3.200000e+01 : f32
    %80 = vector.broadcast %cst_20 : f32 to vector<16x1xf32>
    %81 = arith.divf %79, %80 : vector<16x1xf32>
    %cst_21 = arith.constant 9.99999974E-6 : f32
    %82 = vector.broadcast %cst_21 : f32 to vector<16x1xf32>
    %83 = arith.addf %81, %82 : vector<16x1xf32>
    %84 = math.rsqrt %83 : vector<16x1xf32>
    %85 = vector.broadcast %74 : vector<16x1xf32> to vector<16x32xf32>
    %86 = arith.subf %70, %85 : vector<16x32xf32>
    %87 = vector.broadcast %84 : vector<16x1xf32> to vector<16x32xf32>
    %88 = arith.mulf %86, %87 : vector<16x32xf32>
    %89 = vector.broadcast %10 : vector<1x32xf32> to vector<16x32xf32>
    %90 = arith.mulf %88, %89 : vector<16x32xf32>
    %91 = vector.broadcast %11 : vector<1x32xf32> to vector<16x32xf32>
    %92 = arith.addf %90, %91 : vector<16x32xf32>
    %cst_22 = arith.constant dense<0.000000e+00> : vector<16x128xf32>
    %93 = tpu.matmul %92, %6, %cst_22 {dimension_numbers = #tpu.dot_dimension_numbers<[1], [0], [0], [1], [0, 0, 1, 1], [], []>} : vector<16x32xf32>, vector<32x128xf32>, vector<16x128xf32> -> vector<16x128xf32>
    %94 = vector.broadcast %13 : vector<1x128xf32> to vector<16x128xf32>
    %95 = arith.addf %93, %94 : vector<16x128xf32>
    %cst_23 = arith.constant 1.702000e+00 : f32
    %96 = vector.broadcast %cst_23 : f32 to vector<16x128xf32>
    %97 = arith.mulf %96, %95 : vector<16x128xf32>
    %98 = arith.negf %97 : vector<16x128xf32>
    %99 = math.exp %98 : vector<16x128xf32>
    %cst_24 = arith.constant 1.000000e+00 : f32
    %100 = vector.broadcast %cst_24 : f32 to vector<16x128xf32>
    %101 = arith.addf %100, %99 : vector<16x128xf32>
    %102 = arith.divf %100, %101 : vector<16x128xf32>
    %103 = arith.mulf %95, %102 : vector<16x128xf32>
    %c0_25 = arith.constant 0 : index
    %c0_26 = arith.constant 0 : index
    %104 = vector.load %arg2[%c0_25, %c0_26] : memref<128x32xf32, #tpu.memory_space<vmem>>, vector<128x32xf32>
    %cst_27 = arith.constant dense<0.000000e+00> : vector<16x32xf32>
    %105 = tpu.matmul %103, %104, %cst_27 {dimension_numbers = #tpu.dot_dimension_numbers<[1], [0], [0], [1], [0, 0, 1, 1], [], []>} : vector<16x128xf32>, vector<128x32xf32>, vector<16x32xf32> -> vector<16x32xf32>
    %106 = vector.broadcast %12 : vector<1x32xf32> to vector<16x32xf32>
    %107 = arith.addf %105, %106 : vector<16x32xf32>
    %108 = arith.addf %70, %107 : vector<16x32xf32>
    %c0_28 = arith.constant 0 : index
    %c0_29 = arith.constant 0 : index
    %109 = vector.load %arg5[%c0_28, %c0_29] : memref<16x32xf32, #tpu.memory_space<vmem>>, vector<16x32xf32>
    tpu.vector_store %arg5[%c0_28, %c0_29], %108 {strides = array<i32>} : memref<16x32xf32, #tpu.memory_space<vmem>>, vector<16x32xf32>,
    return
  }
}

</mosaic_0001>

<bundles_post_ra>
// kernel: residual_attention_block.1
= control target key start
LH: loop header
LB: loop body
LE: loop exit
PB: predicated region body
PF: predicated region fallthrough
CT: control target
= control target key end

     0   :  { %vm40_vm0 = vcmask 261120   ;;  %s1595_s0 = inlined_call_operand.vmem [shape: f32[16,32], index: 0, kind: input, shape index: {}]   ;;  %s1596_s1 = inlined_call_operand.vmem [shape: f32[32,256], index: 1, kind: input, shape index: {}]   ;;  %s1597_s2 = inlined_call_operand.vmem [shape: f32[128,32], index: 2, kind: input, shape index: {}]   ;;  %s1598_s3 = inlined_call_operand.vmem [shape: f32[8,128], index: 3, kind: input, shape index: {}]   ;;  %s1599_s4 = inlined_call_operand.vmem [shape: f32[64,48], index: 4, kind: input, shape index: {}]   ;;  %s1600_s5 = inlined_call_operand.hbm [shape: f32[16,32], index: 5, kind: output, shape index: {}]  }
   0x1   :  { %v1324_v0 = vld [vmem:[%s1595_s0] sm:$0xff]  ;;  %v1329_v1 = vld [vmem:[%s1595_s0 + $0x8] sm:$0xff] }
   0x2   :  { %10 = vsyncpa [#allocation3], 0  ;;  %v41_v2 = vsel %vm40_vm0, %v1324_v0, 0.0  ;;  %v44_v3 = vsel %vm40_vm0, %v1329_v1, 0.0  ;;  %v1342_v14 = vld [vmem:[%s1596_s1] sm:$0xff]  ;;  %v1347_v15 = vld [vmem:[%s1596_s1 + $0x10] sm:$0xff]  ;;  %v68_v23 = vlaneseq }
   0x3   :  { %42 = vadd.xlane.f32.xlu0 %v41_v2  ;;  %v1352_v16 = vld [vmem:[%s1596_s1 + $0x20] sm:$0xff]  ;;  %v1203_v17 = vpack.i.bf16 %v1347_v15, %v1342_v14  ;;  %v1121_v18 = vpack.c.bf16 %v1347_v15, %v1342_v14  ;;  %v1361_v19 = vld [vmem:[%s1596_s1 + $0x30] sm:$0xff]  ;;  %s1285_s7 = smov 96   ;;  %v1387_v43 = vld [vmem:[%s1599_s4 + $0x8] sm:$0xff]  ;;  %vm344_vm2 = vcmask 130048   ;;  %s1287_s0 = smov 32  }
   0x4   :  { %v1125_v20 = vpack.c.bf16 %v1361_v19, %v1352_v16  ;;  %v1365_v27 = vshrl.u32 %v68_v23, 7  ;;  %v1371_v30 = vld [vmem:[%s1598_s3] sm:$0xff]  ;;  %v1393_v44 = vld [vmem:[%s1599_s4 + $0x10] sm:$0xff]  ;;  %v1418_v55 = vld [vmem:[%s1599_s4 + $0x18] sm:$0xff] }
   0x5   :  { %1122 = vmatprep.subr.bf16.mxu0 %v1121_v18  ;;  %v1381_v42 = vld [vmem:[%s1599_s4] sm:$0xff]  ;;  %v1405_v46 = vld [vmem:[%s1599_s4 + $0x30] sm:$0xff]  ;;  %v1424_v56 = vld [vmem:[%s1599_s4 + $0x28] sm:$0xff] }
   0x6   :  { %1124 = vmatpush3.bf16.msra.mxu0 %v1121_v18  ;;  %v70_v29 = vsub.s32 0, %v1365_v27  ;;  %v76_v31 = vsub.s32 1, %v1365_v27  ;;  %v1399_v45 = vld [vmem:[%s1599_s4 + $0x20] sm:$0xff]  ;;  %v82_v47 = vsub.s32 7, %v1365_v27  ;;  %v1430_v57 = vld [vmem:[%s1599_s4 + $0x38] sm:$0xff]  ;;  %vm1130_vm1 = vmpackc.low %vm40_vm0, %vm40_vm0  ;;  %s1286_s4 = smov 64  }
   0x7   :  { %45 = vadd.xlane.f32.xlu0 %v44_v3  ;;  %1126 = vmatprep.subr.bf16.mxu0 %v1125_v20 }
   0x8   :  { %v71_v32 = vrot.slane %v1371_v30, %v70_v29  ;;  %v77_v35 = vrot.slane %v1371_v30, %v76_v31  ;;  %v83_v48 = vrot.slane %v1371_v30, %v82_v47 }
   0xa   :  { %1128 = vmatpush3.bf16.msra.mxu0 %v1125_v20 }
  0x90   :  { %v43_v4 = vpop.xlane.xlu0 %42 }
  0x91   :  { %v48_v5 = vmul.f32 0.03125, %v43_v4 }
  0x93   :  { %v50_v6 = vsub.f32 %v1324_v0, %v48_v5 }
  0x94   :  { %v46_v7 = vpop.xlane.xlu0 %45 }
  0x95   :  { %v49_v8 = vmul.f32 0.03125, %v46_v7  ;;  %v52_v9 = vmul.f32 %v50_v6, %v50_v6 }
  0x97   :  { %v51_v10 = vsub.f32 %v1329_v1, %v49_v8  ;;  %v54_v11 = vsel %vm40_vm0, %v52_v9, 0.0 }
  0x98   :  { %55 = vadd.xlane.f32.xlu1 %v54_v11 }
  0x99   :  { %v53_v12 = vmul.f32 %v51_v10, %v51_v10 }
  0x9b   :  { %v57_v13 = vsel %vm40_vm0, %v53_v12, 0.0 }
  0x9c   :  { %58 = vadd.xlane.f32.xlu1 %v57_v13 }
  0xad   :  { %187 = vrot.lane.b32.xlu1 %v1381_v42, %s1285_s7 }
  0xb1   :  { %189 = vrot.lane.b32.xlu1 %v1387_v43, %s1285_s7 }
  0xb5   :  { %191 = vrot.lane.b32.xlu1 %v1393_v44, %s1285_s7 }
  0xb9   :  { %195 = vrot.lane.b32.xlu1 %v1399_v45, %s1285_s7 }
  0xbd   :  { %199 = vrot.lane.b32.xlu1 %v1405_v46, %s1285_s7 }
 0x125   :  { %v56_v21 = vpop.xlane.xlu1 %55 }
 0x126   :  { %v60_v22 = vmul.f32 0.03125, %v56_v21 }
 0x128   :  { %v62_v24 = vadd.f32 1e-05, %v60_v22 }
 0x129   :  { %v59_v25 = vpop.xlane.xlu1 %58 }
 0x12a   :  { %1213 = vrsqrt.f32 %v62_v24  ;;  %v61_v26 = vmul.f32 0.03125, %v59_v25 }
 0x12c   :  { %v63_v28 = vadd.f32 1e-05, %v61_v26 }
 0x12d   :  { %v188_v7 = vpop.permute.xlu1 %187 }
 0x12e   :  { %1215 = vrsqrt.f32 %v63_v28 }
 0x131   :  { %v190_v8 = vpop.permute.xlu1 %189 }
 0x134   :  { %v1214_v33 = vpop.eup %1213 }
 0x135   :  { %v66_v34 = vmul.f32 %v1214_v33, %v50_v6  ;;  %v192_v9 = vpop.permute.xlu1 %191 }
 0x137   :  { %v72_v36 = vmul.f32 %v71_v32, %v66_v34 }
 0x138   :  { %v1216_v37 = vpop.eup %1215 }
 0x139   :  { %v67_v38 = vmul.f32 %v1216_v37, %v51_v10  ;;  %v78_v39 = vadd.f32 %v77_v35, %v72_v36  ;;  %v196_v24 = vpop.permute.xlu1 %195 }
 0x13b   :  { %v73_v40 = vmul.f32 %v71_v32, %v67_v38  ;;  %1029 = vmatprep.mubr.msk.f32.mxu0 %vm40_vm0, %v78_v39 }
 0x13d   :  { %v79_v41 = vadd.f32 %v77_v35, %v73_v40  ;;  %v200_v34 = vpop.permute.xlu1 %199 }
 0x13f   :  { %1030 = vmatmul.mubr.msk.f32.vlgmr.msra.gmra.mrb[0].mxu0 %vm40_vm0, %v79_v41 }
 0x212   :  { %v1031_v49 = vpop.f32.mrb[0].mxu0 }
 0x213   :  { %v162_v50 = vadd.f32 %v1031_v49, %v83_v48  ;;  %v156_v51 = vpop.f32.mrb[1].mxu0 }
 0x214   :  { %v157_v52 = vadd.f32 %v156_v51, %v83_v48 }
 0x215   :  { %v166_v62 = vmul.f32 %v162_v50, %v1387_v43  ;;  %v168_v2 = vmul.f32 %v162_v50, %v1418_v55  ;;  %v170_v4 = vmul.f32 %v162_v50, %v1424_v56  ;;  %v172_v6 = vmul.f32 %v162_v50, %v1430_v57 }
 0x216   :  { %v1410_v53 = vpack.i.bf16 %v162_v50, %v157_v52  ;;  %v165_v54 = vmul.f32 %v157_v52, %v1381_v42  ;;  %v167_v63 = vmul.f32 %v157_v52, %v1393_v44  ;;  %v169_v3 = vmul.f32 %v157_v52, %v1399_v45 }
 0x217   :  { %v171_v5 = vmul.f32 %v157_v52, %v1405_v46 }
 0x218   :  { %1194 = vrot.lane.b32.xlu0 %v1410_v53, %s1285_s7  ;;  %1036 = vmatprep.mubr.msk.f32.mxu1 %vm40_vm0, %v165_v54 }
 0x21c   :  { %193 = vrot.lane.b32.xlu0 %v1418_v55, %s1285_s7 }
 0x220   :  { %197 = vrot.lane.b32.xlu0 %v1424_v56, %s1285_s7 }
 0x224   :  { %201 = vrot.lane.b32.xlu0 %v1430_v57, %s1285_s7 }
 0x28a   :  { %v1195_v58 = vpop.permute.xlu0 %1194 }
 0x28b   :  { %v1197_v59 = vunpack.i.h.bf16 %v1195_v58  ;;  %v1196_v60 = vunpack.i.l.bf16 %v1195_v58 }
 0x28d   :  { %v1129_v61 = vpack.c.bf16 %v1197_v59, %v1196_v60 }
 0x28e   :  { %v194_v13 = vpop.permute.xlu0 %193 }
 0x28f   :  { %1131 = vmatprep.subr.msk.bf16.mxu1 %vm1130_vm1, %v1129_v61 }
 0x290   :  { %1134 = vmatpush3.bf16.xpose.msk.msra.mxu1 %vm1130_vm1, %v1129_v61 }
 0x292   :  { %v198_v26 = vpop.permute.xlu0 %197 }
 0x296   :  { %v202_v39 = vpop.permute.xlu0 %201 }
 0x297   :  { %1037 = vmatmul.mubr.msk.f32.vlgmr.msra.gmra.mrb[0].mxu1 %vm40_vm0, %v166_v62 }
 0x298   :  { %1039 = vmatprep.mubr.msk.f32.mxu1 %vm40_vm0, %v167_v63 }
 0x29b   :  { %1040 = vmatmul.mubr.msk.f32.gmra.mrb[2].mxu1 %vm40_vm0, %v168_v2 }
 0x29c   :  { %1042 = vmatprep.mubr.msk.f32.mxu1 %vm40_vm0, %v169_v3 }
 0x29f   :  { %1043 = vmatmul.mubr.msk.f32.gmra.mrb[4].mxu1 %vm40_vm0, %v170_v4 }
 0x2a0   :  { %1045 = vmatprep.mubr.msk.f32.mxu1 %vm40_vm0, %v171_v5 }
 0x2a3   :  { %1046 = vmatmul.mubr.msk.f32.gmra.mrb[6].mxu1 %vm40_vm0, %v172_v6 }
 0x36a   :  { %v1038_v10 = vpop.f32.mrb[0].mxu1 }
 0x36b   :  { %v311_v11 = vadd.f32 %v1038_v10, %v190_v8  ;;  %v305_v12 = vpop.f32.mrb[1].mxu1 }
 0x36c   :  { %v306_v18 = vadd.f32 %v305_v12, %v188_v7 }
 0x36d   :  { %v348_v20 = vsel %vm344_vm2, %v311_v11, -inf }
 0x36e   :  { %v1041_v21 = vpop.f32.mrb[2].mxu1  ;;  %349 = vmax.xlane.f32.xlu0 %v348_v20  ;;  %v345_v22 = vsel %vm344_vm2, %v306_v18, -inf }
 0x36f   :  { %v315_v23 = vpop.f32.mrb[3].mxu1  ;;  %346 = vmax.xlane.f32.xlu1 %v345_v22  ;;  %v321_v28 = vadd.f32 %v1041_v21, %v194_v13 }
 0x370   :  { %v316_v25 = vadd.f32 %v315_v23, %v192_v9 }
 0x371   :  { %v354_v37 = vsel %vm344_vm2, %v321_v28, -inf }
 0x372   :  { %v1044_v29 = vpop.f32.mrb[4].mxu1  ;;  %v351_v31 = vsel %vm344_vm2, %v316_v25, -inf }
 0x373   :  { %v325_v32 = vpop.f32.mrb[5].mxu1  ;;  %352 = vmax.xlane.f32.xlu0 %v351_v31  ;;  %v331_v35 = vadd.f32 %v1044_v29, %v198_v26 }
 0x374   :  { %v326_v33 = vadd.f32 %v325_v32, %v196_v24 }
 0x375   :  { %v360_v48 = vsel %vm344_vm2, %v331_v35, -inf }
 0x376   :  { %v1047_v36 = vpop.f32.mrb[6].mxu1  ;;  %v357_v38 = vsel %vm344_vm2, %v326_v33, -inf }
 0x377   :  { %v335_v40 = vpop.f32.mrb[7].mxu1  ;;  %355 = vmax.xlane.f32.xlu0 %v354_v37  ;;  %358 = vmax.xlane.f32.xlu1 %v357_v38  ;;  %v341_v47 = vadd.f32 %v1047_v36, %v202_v39 }
 0x378   :  { %v336_v41 = vadd.f32 %v335_v40, %v200_v34  ;;  %v1208_v40 = vpack.i.bf16 %v1361_v19, %v1352_v16 }
 0x379   :  { %v366_v50 = vsel %vm344_vm2, %v341_v47, -inf }
 0x37a   :  { %v363_v49 = vsel %vm344_vm2, %v336_v41, -inf }
 0x37b   :  { %361 = vmax.xlane.f32.xlu0 %v360_v48  ;;  %364 = vmax.xlane.f32.xlu1 %v363_v49 }
 0x37f   :  { %367 = vmax.xlane.f32.xlu0 %v366_v50 }
 0x3fb   :  { %v350_v51 = vpop.xlane.xlu0 %349 }
 0x3fc   :  { %v370_v52 = vsub.f32 %v311_v11, %v350_v51  ;;  %v347_v54 = vpop.xlane.xlu1 %346 }
 0x3fd   :  { %v369_v58 = vsub.f32 %v306_v18, %v347_v54 }
 0x3fe   :  { %v379_v59 = vmul.f32 1.442695, %v370_v52 }
 0x3ff   :  { %v377_v60 = vmul.f32 1.442695, %v369_v58 }
 0x400   :  { %1217 = vpow2.f32 %v379_v59  ;;  %v353_v61 = vpop.xlane.xlu0 %352 }
 0x401   :  { %1219 = vpow2.f32 %v377_v60  ;;  %v371_v62 = vsub.f32 %v316_v25, %v353_v61 }
 0x403   :  { %v381_v63 = vmul.f32 1.442695, %v371_v62 }
 0x404   :  { %v356_v2 = vpop.xlane.xlu0 %355  ;;  %v359_v3 = vpop.xlane.xlu1 %358 }
 0x405   :  { %1221 = vpow2.f32 %v381_v63  ;;  %v372_v4 = vsub.f32 %v321_v28, %v356_v2  ;;  %v373_v5 = vsub.f32 %v326_v33, %v359_v3 }
 0x407   :  { %v383_v6 = vmul.f32 1.442695, %v372_v4  ;;  %v385_v7 = vmul.f32 1.442695, %v373_v5 }
 0x408   :  { %v362_v8 = vpop.xlane.xlu0 %361  ;;  %v365_v9 = vpop.xlane.xlu1 %364 }
 0x409   :  { %1223 = vpow2.f32 %v383_v6  ;;  %v374_v10 = vsub.f32 %v331_v35, %v362_v8  ;;  %v375_v11 = vsub.f32 %v336_v41, %v365_v9 }
 0x40a   :  { %v1457_v12 = vpop.eup %1217  ;;  %1225 = vpow2.f32 %v385_v7 }
 0x40b   :  { %v1220_v13 = vpop.eup %1219  ;;  %v387_v18 = vmul.f32 1.442695, %v374_v10  ;;  %v389_v20 = vmul.f32 1.442695, %v375_v11  ;;  %v396_v21 = vsel %vm344_vm2, %v1457_v12, 0.0 }
 0x40c   :  { %397 = vadd.xlane.f32.xlu0 %v396_v21  ;;  %v368_v22 = vpop.xlane.xlu0 %367  ;;  %v393_v23 = vsel %vm344_vm2, %v1220_v13, 0.0 }
 0x40d   :  { %1227 = vpow2.f32 %v387_v18  ;;  %v376_v24 = vsub.f32 %v341_v47, %v368_v22  ;;  %394 = vadd.xlane.f32.xlu1 %v393_v23 }
 0x40e   :  { %1229 = vpow2.f32 %v389_v20 }
 0x40f   :  { %v1222_v25 = vpop.eup %1221  ;;  %v391_v26 = vmul.f32 1.442695, %v376_v24 }
 0x410   :  { %v399_v28 = vsel %vm344_vm2, %v1222_v25, 0.0 }
 0x411   :  { %1231 = vpow2.f32 %v391_v26  ;;  %400 = vadd.xlane.f32.xlu1 %v399_v28 }
 0x413   :  { %v1224_v29 = vpop.eup %1223 }
 0x414   :  { %v1226_v31 = vpop.eup %1225  ;;  %v402_v32 = vsel %vm344_vm2, %v1224_v29, 0.0 }
 0x415   :  { %403 = vadd.xlane.f32.xlu0 %v402_v32  ;;  %v405_v33 = vsel %vm344_vm2, %v1226_v31, 0.0 }
 0x416   :  { %406 = vadd.xlane.f32.xlu1 %v405_v33 }
 0x417   :  { %v1228_v34 = vpop.eup %1227 }
 0x418   :  { %v1230_v35 = vpop.eup %1229  ;;  %v408_v36 = vsel %vm344_vm2, %v1228_v34, 0.0 }
 0x419   :  { %409 = vadd.xlane.f32.xlu0 %v408_v36  ;;  %v411_v37 = vsel %vm344_vm2, %v1230_v35, 0.0 }
 0x41a   :  { %412 = vadd.xlane.f32.xlu1 %v411_v37 }
 0x41b   :  { %v1232_v38 = vpop.eup %1231 }
 0x41c   :  { %v414_v39 = vsel %vm344_vm2, %v1232_v38, 0.0 }
 0x41d   :  { %415 = vadd.xlane.f32.xlu0 %v414_v39 }
 0x42b   :  { %1199 = vrot.lane.b32.xlu1 %v1410_v53, %s1286_s4 }
 0x42f   :  { %1209 = vrot.lane.b32.xlu1 %v1208_v40, %s1287_s0 }
 0x433   :  { %1204 = vrot.lane.b32.xlu0 %v1203_v17, %s1287_s0 }
 0x499   :  { %v398_v47 = vpop.xlane.xlu0 %397 }
 0x49a   :  { %v395_v41 = vpop.xlane.xlu1 %394 }
 0x49b   :  { %1233 = vrcp.f32 %v395_v41 }
 0x49c   :  { %1235 = vrcp.f32 %v398_v47 }
 0x49e   :  { %v401_v48 = vpop.xlane.xlu1 %400 }
 0x49f   :  { %1237 = vrcp.f32 %v401_v48 }
 0x4a2   :  { %v404_v49 = vpop.xlane.xlu0 %403 }
 0x4a3   :  { %v407_v50 = vpop.xlane.xlu1 %406  ;;  %1239 = vrcp.f32 %v404_v49 }
 0x4a4   :  { %1241 = vrcp.f32 %v407_v50 }
 0x4a5   :  { %v1234_v51 = vpop.eup %1233 }
 0x4a6   :  { %v418_v52 = vmul.f32 %v1234_v51, %v1220_v13  ;;  %v410_v54 = vpop.xlane.xlu0 %409  ;;  %v1236_v58 = vpop.eup %1235 }
 0x4a7   :  { %v413_v53 = vpop.xlane.xlu1 %412  ;;  %1243 = vrcp.f32 %v410_v54  ;;  %v420_v60 = vmul.f32 %v1236_v58, %v1457_v12 }
 0x4a8   :  { %1052 = vmatprep.mubr.msk.f32.mxu0 %vm344_vm2, %v418_v52  ;;  %1245 = vrcp.f32 %v413_v53 }
 0x4a9   :  { %v1238_v59 = vpop.eup %1237 }
 0x4aa   :  { %v416_v17 = vpop.xlane.xlu0 %415  ;;  %v422_v62 = vmul.f32 %v1238_v59, %v1222_v25 }
 0x4ab   :  { %v1200_v16 = vpop.permute.xlu1 %1199  ;;  %1247 = vrcp.f32 %v416_v17 }
 0x4ac   :  { %v1202_v14 = vunpack.i.h.bf16 %v1200_v16  ;;  %v1201_v15 = vunpack.i.l.bf16 %v1200_v16 }
 0x4ad   :  { %v1240_v61 = vpop.eup %1239 }
 0x4ae   :  { %v1135_v19 = vpack.c.bf16 %v1202_v14, %v1201_v15  ;;  %v1205_v63 = vpop.permute.xlu0 %1204  ;;  %v1242_v2 = vpop.eup %1241  ;;  %v424_v5 = vmul.f32 %v1240_v61, %v1224_v29  ;;  %v26_v61 = vld [vmem:[%s1596_s1 + $0x18] sm:$0xff] }
 0x4af   :  { %v1207_v3 = vunpack.i.h.bf16 %v1205_v63  ;;  %v1206_v4 = vunpack.i.l.bf16 %v1205_v63  ;;  %v426_v8 = vmul.f32 %v1242_v2, %v1226_v31  ;;  %v1210_v18 = vpop.permute.xlu1 %1209  ;;  %v28_v63 = vld [vmem:[%s1596_s1 + $0x28] sm:$0xff]  ;;  %v30_v2 = vld [vmem:[%s1596_s1 + $0x38] sm:$0xff] }
 0x4b0   :  { %1136 = vmatprep.subr.bf16.mxu0 %v1135_v19  ;;  %v1212_v20 = vunpack.i.h.bf16 %v1210_v18  ;;  %v1211_v21 = vunpack.i.l.bf16 %v1210_v18 }
 0x4b1   :  { %1138 = vmatpush3.bf16.msra.mxu0 %v1135_v19  ;;  %v1139_v6 = vpack.c.bf16 %v1207_v3, %v1206_v4  ;;  %v1244_v7 = vpop.eup %1243  ;;  %v1151_v3 = vpack.c.bf16 %v30_v2, %v28_v63 }
 0x4b2   :  { %v1246_v9 = vpop.eup %1245  ;;  %v428_v10 = vmul.f32 %v1244_v7, %v1228_v34  ;;  %v1143_v22 = vpack.c.bf16 %v1212_v20, %v1211_v21 }
 0x4b3   :  { %1140 = vmatprep.subr.bf16.mxu0 %v1139_v6  ;;  %v430_v12 = vmul.f32 %v1246_v9, %v1230_v35 }
 0x4b4   :  { %1053 = vmatmul.mubr.msk.f32.vlgmr.msra.gmra.mrb[2].mxu0 %vm344_vm2, %v420_v60  ;;  %v24_v60 = vld [vmem:[%s1596_s1 + $0x8] sm:$0xff] }
 0x4b5   :  { %1055 = vmatprep.mubr.msk.f32.mxu0 %vm344_vm2, %v422_v62  ;;  %1142 = vmatpush3.bf16.msra.mxu0 %v1139_v6  ;;  %v1248_v11 = vpop.eup %1247  ;;  %v1147_v62 = vpack.c.bf16 %v26_v61, %v24_v60 }
 0x4b6   :  { %v432_v13 = vmul.f32 %v1248_v11, %v1232_v38  ;;  %1144 = vmatprep.subr.bf16.mxu0 %v1143_v22  ;;  %v719_v11 = vsub.s32 4, %v1365_v27 }
 0x4b8   :  { %1056 = vmatmul.mubr.msk.f32.gmra.mrb[4].mxu0 %vm344_vm2, %v424_v5 }
 0x4b9   :  { %1058 = vmatprep.mubr.msk.f32.mxu0 %vm344_vm2, %v426_v8  ;;  %1146 = vmatpush3.bf16.msra.mxu0 %v1143_v22  ;;  %v720_v22 = vrot.slane %v1371_v30, %v719_v11 }
 0x4ba   :  { %1148 = vmatprep.subr.bf16.mxu0 %v1147_v62 }
 0x4bc   :  { %1059 = vmatmul.mubr.msk.f32.gmra.mrb[6].mxu0 %vm344_vm2, %v428_v10  ;;  %v713_v10 = vsub.s32 3, %v1365_v27 }
 0x4bd   :  { %1061 = vmatprep.mubr.msk.f32.mxu0 %vm344_vm2, %v430_v12 }
 0x4be   :  { %v714_v12 = vrot.slane %v1371_v30, %v713_v10 }
 0x4c0   :  { %1062 = vmatmul.mubr.msk.f32.gmra.mrb[8].mxu0 %vm344_vm2, %v432_v13 }
 0x587   :  { %v1054_v23 = vpop.f32.mrb[2].mxu0 }
 0x588   :  { %v529_v24 = vpop.f32.mrb[3].mxu0  ;;  %v569_v26 = vmul.f32 %v1054_v23, %v1387_v43 }
 0x589   :  { %v568_v31 = vmul.f32 %v529_v24, %v1381_v42 }
 0x58b   :  { %v1057_v25 = vpop.f32.mrb[4].mxu0 }
 0x58c   :  { %v571_v28 = vmul.f32 %v1057_v25, %v1418_v55  ;;  %v539_v29 = vpop.f32.mrb[5].mxu0 }
 0x58d   :  { %v570_v32 = vmul.f32 %v539_v29, %v1393_v44  ;;  %v584_v44 = vsub.s32 2, %v1365_v27  ;;  %v825_v29 = vld [vmem:[%s1597_s2 + $0x8] sm:$0xff] }
 0x58e   :  { %v577_v33 = vadd.f32 %v571_v28, %v569_v26  ;;  %v824_v28 = vld [vmem:[%s1597_s2] sm:$0xff] }
 0x58f   :  { %v576_v34 = vadd.f32 %v570_v32, %v568_v31  ;;  %v1060_v35 = vpop.f32.mrb[6].mxu0  ;;  %v1155_v31 = vpack.c.bf16 %v825_v29, %v824_v28  ;;  %v826_v32 = vld [vmem:[%s1597_s2 + $0x10] sm:$0xff] }
 0x590   :  { %v573_v36 = vmul.f32 %v1060_v35, %v1424_v56  ;;  %v549_v37 = vpop.f32.mrb[7].mxu0  ;;  %v585_v56 = vrot.slane %v1371_v30, %v584_v44  ;;  %v828_v35 = vld [vmem:[%s1597_s2 + $0x20] sm:$0xff] }
 0x591   :  { %v572_v38 = vmul.f32 %v549_v37, %v1399_v45  ;;  %1156 = vmatprep.subr.bf16.mxu1 %v1155_v31  ;;  %v836_v44 = vld [vmem:[%s1597_s2 + $0x60] sm:$0xff] }
 0x592   :  { %v579_v39 = vadd.f32 %v577_v33, %v573_v36  ;;  %1158 = vmatpush3.bf16.msra.mxu1 %v1155_v31  ;;  %v827_v33 = vld [vmem:[%s1597_s2 + $0x18] sm:$0xff]  ;;  %v829_v36 = vld [vmem:[%s1597_s2 + $0x28] sm:$0xff] }
 0x593   :  { %v578_v40 = vadd.f32 %v576_v34, %v572_v38  ;;  %v1063_v41 = vpop.f32.mrb[8].mxu0  ;;  %v1159_v34 = vpack.c.bf16 %v827_v33, %v826_v32  ;;  %v1163_v37 = vpack.c.bf16 %v829_v36, %v828_v35  ;;  %v830_v38 = vld [vmem:[%s1597_s2 + $0x30] sm:$0xff] }
 0x594   :  { %v575_v43 = vmul.f32 %v1063_v41, %v1430_v57  ;;  %v559_v47 = vpop.f32.mrb[9].mxu0  ;;  %v832_v41 = vld [vmem:[%s1597_s2 + $0x40] sm:$0xff] }
 0x595   :  { %v574_v55 = vmul.f32 %v559_v47, %v1405_v46  ;;  %1160 = vmatprep.subr.bf16.mxu1 %v1159_v34 }
 0x596   :  { %v581_v48 = vadd.f32 %v579_v39, %v575_v43  ;;  %1162 = vmatpush3.bf16.msra.mxu1 %v1159_v34  ;;  %v831_v39 = vld [vmem:[%s1597_s2 + $0x38] sm:$0xff]  ;;  %v833_v43 = vld [vmem:[%s1597_s2 + $0x48] sm:$0xff] }
 0x597   :  { %v580_v42 = vadd.f32 %v578_v40, %v574_v55  ;;  %1164 = vmatprep.subr.bf16.mxu1 %v1163_v37  ;;  %v1167_v40 = vpack.c.bf16 %v831_v39, %v830_v38  ;;  %v1171_v47 = vpack.c.bf16 %v833_v43, %v832_v41  ;;  %v834_v55 = vld [vmem:[%s1597_s2 + $0x50] sm:$0xff] }
 0x599   :  { %1072 = vmatprep.mubr.msk.f32.mxu0 %vm40_vm0, %v580_v42 }
 0x59a   :  { %1073 = vmatmul.mubr.msk.f32.vlgmr.msra.gmra.mrb[10].mxu0 %vm40_vm0, %v581_v48  ;;  %1166 = vmatpush3.bf16.msra.mxu1 %v1163_v37  ;;  %v835_v48 = vld [vmem:[%s1597_s2 + $0x58] sm:$0xff] }
 0x59b   :  { %1150 = vmatpush3.bf16.msra.mxu0 %v1147_v62  ;;  %1168 = vmatprep.subr.bf16.mxu1 %v1167_v40  ;;  %v1175_v42 = vpack.c.bf16 %v835_v48, %v834_v55 }
 0x59c   :  { %1152 = vmatprep.subr.bf16.mxu0 %v1151_v3 }
 0x59e   :  { %1170 = vmatpush3.bf16.msra.mxu1 %v1167_v40 }
 0x59f   :  { %1154 = vmatpush3.bf16.msra.mxu0 %v1151_v3  ;;  %1172 = vmatprep.subr.bf16.mxu1 %v1171_v47 }
 0x5a2   :  { %1174 = vmatpush3.bf16.msra.mxu1 %v1171_v47 }
 0x5a3   :  { %1176 = vmatprep.subr.bf16.mxu1 %v1175_v42 }
 0x5a6   :  { %1178 = vmatpush3.bf16.msra.mxu1 %v1175_v42 }
 0x66d   :  { %v1074_v49 = vpop.f32.mrb[10].mxu0 }
 0x66e   :  { %v680_v45 = vadd.f32 %v1074_v49, %v585_v56  ;;  %v674_v50 = vpop.f32.mrb[11].mxu0 }
 0x66f   :  { %v675_v51 = vadd.f32 %v674_v50, %v585_v56  ;;  %v837_v56 = vld [vmem:[%s1597_s2 + $0x68] sm:$0xff]  ;;  %v839_v50 = vld [vmem:[%s1597_s2 + $0x78] sm:$0xff] }
 0x670   :  { %v1496_v52 = vadd.f32 %v680_v45, %v1329_v1  ;;  %v1179_v49 = vpack.c.bf16 %v837_v56, %v836_v44  ;;  %v838_v45 = vld [vmem:[%s1597_s2 + $0x70] sm:$0xff]  ;;  %s1288_s2 = smov [#allocation2]  }
 0x671   :  { %v1499_v57 = vadd.f32 %v675_v51, %v1324_v0  ;;  %v1183_v51 = vpack.c.bf16 %v839_v50, %v838_v45  ;;  %s928_s6 = sshll.u32 %s1288_s2, 4  ;;  %s929_s6 = int_to_ptr.vmem [resolvable:$true] %s928_s6 }
 0x672   :  { %v688_v46 = vsel %vm40_vm0, %v1496_v52, 0.0  ;;  %1180 = vmatprep.subr.bf16.mxu1 %v1179_v49  ;;  %s1261_s7 = scalar_lea.vmem %s929_s6, 256  ;;  %p1266_p1 = scmp.lt.s32.totalorder %s929_s6, %s929_s6 }
 0x673   :  { %689 = vadd.xlane.f32.xlu0 %v688_v46  ;;  %v685_v53 = vsel %vm40_vm0, %v1499_v57, 0.0  ;;  %1182 = vmatpush3.bf16.msra.mxu1 %v1179_v49  ;;  %v725_v46 = vsub.s32 6, %v1365_v27  ;;  %p1262_p0 = scmp.ne.s32.totalorder %s929_s6, %s1261_s7  ;;  %p1267_p2 = scmp.lt.s32.totalorder %s1261_s7, %s1261_s7 }
 0x674   :  { %686 = vadd.xlane.f32.xlu1 %v685_v53  ;;  %1184 = vmatprep.subr.bf16.mxu1 %v1183_v51 }
 0x675   :  { %v726_v53 = vrot.slane %v1371_v30, %v725_v46  ;;  %p1268_p3 = por %p1267_p2, %p1266_p1 }
 0x677   :  { %1186 = vmatpush3.bf16.msra.mxu1 %v1183_v51  ;;  %p1269_p4 = pnand %p1268_p3, %p1262_p0 }
 0x700   :  { %v690_v54 = vpop.xlane.xlu0 %689 }
 0x701   :  { %v692_v16 = vmul.f32 0.03125, %v690_v54  ;;  %v687_v14 = vpop.xlane.xlu1 %686 }
 0x702   :  { %v691_v15 = vmul.f32 0.03125, %v687_v14 }
 0x703   :  { %v694_v17 = vsub.f32 %v1496_v52, %v692_v16 }
 0x704   :  { %v693_v1 = vsub.f32 %v1499_v57, %v691_v15 }
 0x705   :  { %v696_v19 = vmul.f32 %v694_v17, %v694_v17 }
 0x706   :  { %v695_v58 = vmul.f32 %v693_v1, %v693_v1 }
 0x707   :  { %v700_v0 = vsel %vm40_vm0, %v696_v19, 0.0 }
 0x708   :  { %701 = vadd.xlane.f32.xlu1 %v700_v0  ;;  %v697_v59 = vsel %vm40_vm0, %v695_v58, 0.0 }
 0x709   :  { %698 = vadd.xlane.f32.xlu0 %v697_v59 }
 0x795   :  { %v702_v4 = vpop.xlane.xlu1 %701 }
 0x796   :  { %v704_v5 = vmul.f32 0.03125, %v702_v4  ;;  %v699_v6 = vpop.xlane.xlu0 %698  ;;  %v842_v4 = vsub.s32 5, %v1365_v27 }
 0x797   :  { %v703_v7 = vmul.f32 0.03125, %v699_v6 }
 0x798   :  { %v706_v8 = vadd.f32 1e-05, %v704_v5  ;;  %v843_v5 = vrot.slane %v1371_v30, %v842_v4 }
 0x799   :  { %v705_v9 = vadd.f32 1e-05, %v703_v7 }
 0x79a   :  { %1249 = vrsqrt.f32 %v706_v8 }
 0x79b   :  { %1251 = vrsqrt.f32 %v705_v9 }
 0x7a4   :  { %v1250_v13 = vpop.eup %1249 }
 0x7a5   :  { %v1252_v18 = vpop.eup %1251  ;;  %v710_v20 = vmul.f32 %v1250_v13, %v694_v17 }
 0x7a6   :  { %v709_v21 = vmul.f32 %v1252_v18, %v693_v1 }
 0x7a7   :  { %v716_v23 = vmul.f32 %v714_v12, %v710_v20 }
 0x7a8   :  { %v715_v24 = vmul.f32 %v714_v12, %v709_v21 }
 0x7a9   :  { %v722_v26 = vadd.f32 %v720_v22, %v716_v23 }
 0x7aa   :  { %v721_v25 = vadd.f32 %v720_v22, %v715_v24 }
 0x7ac   :  { %1083 = vmatprep.mubr.msk.f32.mxu0 %vm40_vm0, %v721_v25 }
 0x7ad   :  { %1084 = vmatmul.mubr.msk.f32.vlgmr.msra.gmra.mrb[12].mxu0 %vm40_vm0, %v722_v26 }
 0x880   :  { %v1085_v54 = vpop.f32.mrb[12].mxu0 }
 0x881   :  { %v805_v16 = vadd.f32 %v1085_v54, %v726_v53  ;;  %v799_v14 = vpop.f32.mrb[13].mxu0 }
 0x882   :  { %v800_v15 = vadd.f32 %v799_v14, %v726_v53 }
 0x883   :  { %v964_v17 = vmul.f32 -1.702, %v805_v16 }
 0x884   :  { %v963_v1 = vmul.f32 -1.702, %v800_v15 }
 0x885   :  { %v814_v19 = vmul.f32 1.442695, %v964_v17 }
 0x886   :  { %v812_v58 = vmul.f32 1.442695, %v963_v1 }
 0x887   :  { %1253 = vpow2.f32 %v814_v19 }
 0x888   :  { %1255 = vpow2.f32 %v812_v58 }
 0x891   :  { %v1254_v0 = vpop.eup %1253 }
 0x892   :  { %v1256_v59 = vpop.eup %1255  ;;  %v817_v60 = vadd.f32 1.0, %v1254_v0 }
 0x893   :  { %v816_v61 = vadd.f32 1.0, %v1256_v59 }
 0x894   :  { %1257 = vrcp.f32 %v817_v60 }
 0x895   :  { %1259 = vrcp.f32 %v816_v61 }
 0x89e   :  { %v1258_v62 = vpop.eup %1257 }
 0x89f   :  { %v1260_v63 = vpop.eup %1259  ;;  %v823_v3 = vmul.f32 %v1258_v62, %v805_v16 }
 0x8a0   :  { %v822_v2 = vmul.f32 %v1260_v63, %v800_v15 }
 0x8a2   :  { %1118 = vmatprep.mubr.f32.mxu1 %v822_v2 }
 0x8a3   :  { %1119 = vmatmul.mubr.f32.vlgmr.msra.gmra.mrb[8].mxu1 %v823_v3 }
 0x976   :  { %v1120_v6 = vpop.f32.mrb[8].mxu1 }
 0x977   :  { %v916_v7 = vadd.f32 %v1120_v6, %v843_v5  ;;  %v910_v8 = vpop.f32.mrb[9].mxu1 }
 0x978   :  { %v911_v9 = vadd.f32 %v910_v8, %v843_v5 }
 0x979   :  { %v920_v10 = vadd.f32 %v916_v7, %v1496_v52 }
 0x97a   :  { %v919_v11 = vadd.f32 %v911_v9, %v1499_v57 }
 0x97b   :  { %922 = vst.msk [vmem:[#allocation2 + $0x8] sm:$0xff] %vm40_vm0, %v920_v10 }
 0x97c   :  { %921 = vst.msk [vmem:[#allocation2] sm:$0xff] %vm40_vm0, %v919_v11 }
 0x97d   :  { %1272 = shalt.err (!%p1269_p4)
}
 0x97e   :  { %s1273_s10 = scalar_lea.hbm %s1600_s5, 256 }
 0x97f   :  { %p1274_p5 = scmp.ne.s32.totalorder %s1600_s5, %s1273_s10  ;;  %p1277_p6 = scmp.lt.u32.totalorder %s1273_s10, %s1600_s5 }
 0x981   :  { %p1279_p7 = pnand %p1277_p6, %p1274_p5 }
 0x983   :  { %1282 = shalt.err (!%p1279_p7)
}
 0x984   :  { %s1289_s15 = smov 128   ;;  %s1290_s16 = smov 8  }
 0x985   :  { %934 = dma.vmem_to_hbm [thread:$0]  %s929_s6, 256, %s1600_s5, [#allocation3], %s1289_s15, %s1289_s15, %s1290_s16  }
 0x986   :  { %1283 = dma.done.wait [#allocation3], 256  }
 0x987   :  { %1284 = vsyncadd [#allocation3], 4294967040 }
 0x988   :  { %938 = vsyncpa [#allocation3], 1 }

</bundles_post_ra>
